<compile_context>
chip_gen: v7x
topology: tpu7x:2x2x1
jax: 0.10.0
libtpu: 0.0.40
codegen_flags: <defaults>
</compile_context>

<pallas_src>
from functools import partial

import jax
import jax.numpy as jnp
from jax.experimental import pallas as pl
from jax.experimental.pallas import tpu as pltpu


def _round_up(n, m):
    return ((n + m - 1) // m) * m


def _fused_conv_kernel(p_ref, w_ref, o_ref):
    # p_ref: (KP, PP)  im2col patches (+ ones row for bias), zero-padded
    # w_ref: (OCP, KP) conv1+conv2 weights with bias column, zero-padded
    # o_ref: (OCP, PP) single lane-dense output tile (one unmasked store)
    o_ref[...] = jnp.dot(w_ref[...], p_ref[...], preferred_element_type=jnp.float32)


def prepare_fused_params(w1, b1, w2, b2):
    """Done ONCE (weights/biases are module parameters, not per-call data).

    Returns w_pad of shape (OCP, KP):
      rows 0..2*OC-1 = [conv1; conv2] weights, column K = bias, rest zeros.
    """
    OC, C, KH, KW = w1.shape
    K = C * KH * KW
    w_cat = jnp.concatenate([w1.reshape(OC, K), w2.reshape(OC, K)], axis=0)   # (2OC, K)
    b_cat = jnp.concatenate([b1, b2], axis=0).reshape(2 * OC, 1)              # (2OC, 1)
    wb = jnp.concatenate([w_cat, b_cat], axis=1)                              # (2OC, K+1)
    OCP = _round_up(2 * OC, 8)      # 6  -> 8  sublanes
    KP = _round_up(K + 1, 8)        # 28 -> 32
    wb = jnp.pad(wb, ((0, OCP - 2 * OC), (0, KP - (K + 1))))
    return wb                                                                  # (OCP, KP)


@partial(jax.jit, static_argnames=("oc", "kh", "kw"))
def dual_conv2d_cat(x, w_pad, *, oc, kh, kw):
    """cat([conv2d(x, w1, b1), conv2d(x, w2, b2)], dim=0) for NCHW x.

    x:     (B, C, H, W)
    w_pad: (OCP, KP) fused+padded weight/bias matrix from prepare_fused_params
    returns (2*B, OC, OH, OW)   (torch.cat along dim 0 semantics)
    """
    B, C, H, W = x.shape
    OH, OW = H - kh + 1, W - kw + 1
    K = C * kh * kw
    P = OH * OW
    OCP, KP = w_pad.shape
    PP = _round_up(P, 128)          # lane-dense output / MXU N-dim

    # im2col (fuses into one XLA fusion under jit):
    # patches[b, c*kh*kw + i*kw + j, oh*OW + ow] = x[b, c, oh+i, ow+j]
    cols = []
    for i in range(kh):
        for j in range(kw):
            cols.append(x[:, :, i:i + OH, j:j + OW])          # (B, C, OH, OW)
    patches = jnp.stack(cols, axis=2).reshape(B, K, P)        # (B, K, P)
    ones = jnp.ones((B, 1, P), dtype=patches.dtype)           # bias rides the matmul
    patches = jnp.concatenate([patches, ones], axis=1)        # (B, K+1, P)
    patches = jnp.pad(patches, ((0, 0), (0, KP - (K + 1)), (0, PP - P)))

    out = pl.pallas_call(
        _fused_conv_kernel,
        out_shape=jax.ShapeDtypeStruct((B, OCP, PP), jnp.float32),
        grid=(B,),
        in_specs=[
            pl.BlockSpec((None, KP, PP), lambda b: (b, 0, 0)),   # per-image patch tile
            pl.BlockSpec((OCP, KP), lambda b: (0, 0)),           # weights VMEM-resident
        ],
        out_specs=pl.BlockSpec((None, OCP, PP), lambda b: (b, 0, 0)),
        compiler_params=pltpu.CompilerParams(dimension_semantics=("parallel",)),
    )(patches, w_pad)

    # strip padding, split conv1/conv2, cat along batch like torch.cat(dim=0)
    y = out[:, :2 * oc, :P].reshape(B, 2, oc, OH, OW)
    return jnp.concatenate([y[:, 0], y[:, 1]], axis=0)        # (2B, OC, OH, OW)


def _reference(x, w1, b1, w2, b2):
    dn = jax.lax.conv_dimension_numbers(x.shape, w1.shape, ("NCHW", "OIHW", "NCHW"))
    y1 = jax.lax.conv_general_dilated(x, w1, (1, 1), "VALID", dimension_numbers=dn)
    y2 = jax.lax.conv_general_dilated(x, w2, (1, 1), "VALID", dimension_numbers=dn)
    y1 = y1 + b1.reshape(1, -1, 1, 1)
    y2 = y2 + b2.reshape(1, -1, 1, 1)
    return jnp.concatenate([y1, y2], axis=0)


if __name__ == "__main__":
    key = jax.random.PRNGKey(0)
    kx, k1, k2, k3, k4 = jax.random.split(key, 5)

    # Shapes implied by the module: x (1,3,4,4), Conv2d(3,3,3) -> weights (3,3,3,3), bias (3,)
    x = jax.random.normal(kx, (1, 3, 4, 4), dtype=jnp.float32)
    w1 = jax.random.normal(k1, (3, 3, 3, 3), dtype=jnp.float32) * 0.1
    b1 = jax.random.normal(k2, (3,), dtype=jnp.float32) * 0.1
    w2 = jax.random.normal(k3, (3, 3, 3, 3), dtype=jnp.float32) * 0.1
    b2 = jax.random.normal(k4, (3,), dtype=jnp.float32) * 0.1

    # One-time parameter prep (bias folded in, padded to (8, 32)).
    w_pad = prepare_fused_params(w1, b1, w2, b2)

    out = dual_conv2d_cat(x, w_pad, oc=3, kh=3, kw=3)
    out = jax.block_until_ready(out)

    ref = _reference(x, w1, b1, w2, b2)
    assert out.shape == (2, 3, 2, 2), out.shape
    assert jnp.allclose(out, ref, atol=1e-5, rtol=1e-5), "mismatch vs reference conv"

    print("KERNEL_OK")
</pallas_src>

<mosaic_0001>
module attributes {stable_mosaic.version = 11 : i64} {
  func.func @_fused_conv_kernel(%arg0: i32, %arg1: memref<1x32x128xf32, #tpu.memory_space<vmem>>, %arg2: memref<8x32xf32, #tpu.memory_space<vmem>>, %arg3: memref<1x8x128xf32, #tpu.memory_space<vmem>>) attributes {dimension_semantics = [#tpu.dimension_semantics<parallel>], iteration_bounds = array<i64: 1>, scalar_prefetch = 0 : i64, scratch_operands = 0 : i64, tpu.core_type = #tpu.core_type<tc>, window_params = [{transform_indices = @transform_0, window_bounds = array<i64: 1, 32, 128>}, {pipeline_mode = #tpu.pipeline_mode<synchronous>, transform_indices = @transform_1, window_bounds = array<i64: 8, 32>}, {transform_indices = @transform_2, window_bounds = array<i64: 1, 8, 128>}]} {
    %c0 = arith.constant 0 : index
    %c0_0 = arith.constant 0 : index
    %0 = vector.load %arg2[%c0, %c0_0] : memref<8x32xf32, #tpu.memory_space<vmem>>, vector<8x32xf32>
    %c0_1 = arith.constant 0 : index
    %c0_2 = arith.constant 0 : index
    %c0_3 = arith.constant 0 : index
    %1 = vector.load %arg1[%c0_1, %c0_2, %c0_3] : memref<1x32x128xf32, #tpu.memory_space<vmem>>, vector<1x32x128xf32>
    %2 = vector.shape_cast %1 : vector<1x32x128xf32> to vector<32x128xf32>
    %cst = arith.constant dense<0.000000e+00> : vector<8x128xf32>
    %3 = tpu.matmul %0, %2, %cst {dimension_numbers = #tpu.dot_dimension_numbers<[1], [0], [0], [1], [0, 0, 1, 1], [], []>} : vector<8x32xf32>, vector<32x128xf32>, vector<8x128xf32> -> vector<8x128xf32>
    %c0_4 = arith.constant 0 : index
    %c0_5 = arith.constant 0 : index
    %c0_6 = arith.constant 0 : index
    %4 = vector.load %arg3[%c0_4, %c0_5, %c0_6] : memref<1x8x128xf32, #tpu.memory_space<vmem>>, vector<1x8x128xf32>
    %5 = vector.shape_cast %4 : vector<1x8x128xf32> to vector<8x128xf32>
    %6 = vector.shape_cast %3 : vector<8x128xf32> to vector<1x8x128xf32>
    tpu.vector_store %arg3[%c0_4, %c0_5, %c0_6], %6 {strides = array<i32>} : memref<1x8x128xf32, #tpu.memory_space<vmem>>, vector<1x8x128xf32>,
    return
  }
  func.func @transform_0(%arg0: i32) -> (i32, i32, i32) {
    %c0_i32 = arith.constant 0 : i32
    %c0_i32_0 = arith.constant 0 : i32
    %c0_i32_1 = arith.constant 0 : i32
    return %arg0, %c0_i32, %c0_i32_0 : i32, i32, i32
  }
  func.func @transform_1(%arg0: i32) -> (i32, i32) {
    %c0_i32 = arith.constant 0 : i32
    %c0_i32_0 = arith.constant 0 : i32
    %c0_i32_1 = arith.constant 0 : i32
    return %c0_i32, %c0_i32_0 : i32, i32
  }
  func.func @transform_2(%arg0: i32) -> (i32, i32, i32) {
    %c0_i32 = arith.constant 0 : i32
    %c0_i32_0 = arith.constant 0 : i32
    %c0_i32_1 = arith.constant 0 : i32
    return %arg0, %c0_i32, %c0_i32_0 : i32, i32, i32
  }
}

</mosaic_0001>

<bundles_post_ra>
// kernel: dual_conv2d_cat.1
= control target key start
LH: loop header
LB: loop body
LE: loop exit
PB: predicated region body
PF: predicated region fallthrough
CT: control target
= control target key end

     0   :  { %v121_v0 = vmov 0.0|0.0   ;;  %vm122_vm0 = vmmov 0   ;;  %v123_v4 = vmov 0.0   ;;  %vm16_vm1 = vcmask 261120   ;;  %s157_s0 = inlined_call_operand.vmem [shape: f32[1,32,128], index: 0, kind: input, shape index: {}]   ;;  %s158_s1 = inlined_call_operand.vmem [shape: f32[8,32], index: 1, kind: input, shape index: {}]   ;;  %s159_s2 = inlined_call_operand.vmem [shape: f32[1,8,128], index: 2, kind: output, shape index: {}]  }
   0x1   :  { %112 = vmatprep.subr.bf16.mxu0 %v121_v0  ;;  %v12_v1 = vld [vmem:[%s157_s0] sm:$0xff]  ;;  %v13_v2 = vld [vmem:[%s157_s0 + $0x8] sm:$0xff]  ;;  %v14_v3 = vld [vmem:[%s157_s0 + $0x10] sm:$0xff]  ;;  %109 = vmatprep.mubr.msk.f32.mxu0 %vm122_vm0, %v123_v4 }
   0x2   :  { %v113_v5 = vpack.c.bf16 %v13_v2, %v12_v1  ;;  %v15_v6 = vld [vmem:[%s157_s0 + $0x18] sm:$0xff]  ;;  %v11_v8 = vld [vmem:[%s158_s1] sm:$0xff] }
   0x3   :  { %v116_v7 = vpack.c.bf16 %v15_v6, %v14_v3 }
   0x4   :  { %114 = vmatpush3.bf16.msra.mxu0 %v113_v5 }
   0x5   :  { %115 = vmatprep.subr.bf16.mxu0 %v121_v0 }
   0x8   :  { %117 = vmatpush3.bf16.msra.mxu0 %v116_v7 }
   0xb   :  { %110 = vmatmul.mubr.msk.f32.vlgmr.msra.gmra.mrb[0].mxu0 %vm16_vm1, %v11_v8 }
  0xde   :  { %v86_v9 = vpop.f32.mrb[0].mxu0 }
  0xdf   :  { %90 = vst [vmem:[%s159_s2] sm:$0xff] %v86_v9  ;;  %v111_v10 = vpop.f32.mrb[1].mxu0 }

</bundles_post_ra>
